<compile_context>
chip_gen: v6e
topology: v6e:2x2x1
jax: 0.10.0
libtpu: 0.0.40
codegen_flags: <defaults>
</compile_context>

<pallas_src>
import jax
import jax.numpy as jnp
from jax.experimental import pallas as pl
from jax.experimental.pallas import tpu as pltpu


def _final_layer_kernel(x_ref, srow_ref, w_ref, beff_ref, o_ref, weff_ref):
    # x_ref    : (1, tT, H)   activations tile
    # srow_ref : (1, 1, H)    (1 + scale) row for this batch element (f32)
    # w_ref    : (H, O)       final linear weight (grid-invariant block)
    # beff_ref : (1, 1, O)    shift @ W + b (precomputed in the wrapper, f32)
    # o_ref    : (1, tT, O)   output tile
    # weff_ref : (H, O)       scratch: (1+scale)-folded weight, cached over t

    # Fold (1 + scale) into the weight ONCE per batch element (t == 0). The t
    # grid axis is "arbitrary", so this scratch stays valid for all later t.
    @pl.when(pl.program_id(1) == 0)
    def _():
        s_col = jnp.transpose(srow_ref[0].astype(jnp.float32))   # (H, 1), once per b
        w_f32 = w_ref[...].astype(jnp.float32)                   # (H, O)
        weff_ref[...] = (w_f32 * s_col).astype(weff_ref.dtype)

    # ---- LayerNorm (no affine, eps=1e-6); centered two-pass stats in f32 ----
    xf = x_ref[0].astype(jnp.float32)                            # (tT, H)
    mean = jnp.mean(xf, axis=-1, keepdims=True)                  # (tT, 1)
    xc = xf - mean
    var = jnp.mean(xc * xc, axis=-1, keepdims=True)              # (tT, 1)
    x_norm = xc * jax.lax.rsqrt(var + 1e-6)                      # (tT, H) f32

    # ---- final linear on the MXU; accumulate in f32 ----
    y = jnp.dot(x_norm.astype(weff_ref.dtype), weff_ref[...],
                preferred_element_type=jnp.float32)              # (tT, O)
    o_ref[0] = (y + beff_ref[0].astype(jnp.float32)).astype(o_ref.dtype)


def _pick_seq_tile(T, dtype, max_tile):
    """Sequence tile: whole T when it fits (block == full dim is always legal);
    otherwise the largest sublane-packed multiple <= max_tile. A non-dividing T
    is handled by a cdiv grid with a masked partial last block."""
    if T <= max_tile:
        return T
    pack = 8 * max(1, 4 // jnp.dtype(dtype).itemsize)   # f32: 8, bf16: 16, int8: 32
    return max(pack, (max_tile // pack) * pack)


def final_layer(x, c, w_ada, b_ada, w_lin, b_lin, *,
                max_seq_tile=512, use_bf16_matmul=False):
    """x: (B, T, H), c: (B, H), w_ada: (H, 2H), b_ada: (2H,),
       w_lin: (H, O), b_lin: (O,)  -> (B, T, O)"""
    B, T, H = x.shape
    O = w_lin.shape[1]

    # ---- adaLN hoisted out of the kernel: one small (B,H)x(H,2H) XLA matmul ----
    cf = c.astype(jnp.float32)
    ada = jax.nn.silu(cf) @ w_ada.astype(jnp.float32) + b_ada.astype(jnp.float32)
    shift, scale = ada[:, :H], ada[:, H:]                        # (B, H) each, f32

    # ---- fold `+ shift` into the bias: b_eff = shift @ W + b, shape (B,1,O) ----
    b_eff = (shift @ w_lin.astype(jnp.float32)
             + b_lin.astype(jnp.float32)).reshape(B, 1, O)
    # (1 + scale) as a lane-dense row per batch element: (B, 1, H) f32
    s_row = (1.0 + scale).reshape(B, 1, H)

    # dtype fed to the MXU (opt-in bf16; default keeps f32 parity with the ref)
    mxu_dtype = jnp.bfloat16 if use_bf16_matmul else x.dtype

    # ---- sequence tiling: large tiles amortize per-step pipeline overhead ----
    tT = _pick_seq_tile(T, x.dtype, max_seq_tile)
    nT = pl.cdiv(T, tT)

    # ---- VMEM budget (lane-padded, double-buffered tiles + f32 temporaries) ----
    lane = 128
    Hl = -(-H // lane) * lane
    Ol = -(-O // lane) * lane
    xsz = x.dtype.itemsize
    wsz = w_lin.dtype.itemsize
    msz = jnp.dtype(mxu_dtype).itemsize
    vmem_needed = (
        2 * tT * Hl * xsz          # x tiles (double-buffered)
        + 2 * tT * Ol * xsz        # output tiles (double-buffered)
        + 2 * Hl * Ol * wsz        # weight (default pipeline buffers)
        + Hl * Ol * msz            # w_eff scratch
        + 4 * tT * Hl * 4          # f32 LN temporaries + slack
        + tT * Ol * 4              # f32 matmul accumulator
        + 4 * (Hl + Ol) * 4        # s_row + b_eff (tiny)
    )
    try:
        vmem_cap = pltpu.get_tpu_info().vmem_capacity_bytes
    except Exception:
        vmem_cap = 64 * 2**20      # conservative: v7x per-core VMEM
    vmem_limit = int(min(int(0.75 * vmem_cap),
                         max(16 * 2**20, int(1.5 * vmem_needed))))

    cost = pl.CostEstimate(
        flops=int(2 * B * T * H * O + 8 * B * T * H + 3 * B * H * O),
        transcendentals=int(B * T),
        bytes_accessed=int(B * T * H * xsz + B * T * O * xsz
                           + H * O * wsz + 2 * B * (H + O) * 4),
    )

    return pl.pallas_call(
        _final_layer_kernel,
        out_shape=jax.ShapeDtypeStruct((B, T, O), x.dtype),
        grid_spec=pltpu.PrefetchScalarGridSpec(
            num_scalar_prefetch=0,
            grid=(B, nT),
            in_specs=[
                pl.BlockSpec((1, tT, H), lambda b, t: (b, t, 0)),   # x
                pl.BlockSpec((1, 1, H), lambda b, t: (b, 0, 0)),    # (1+scale) row
                pl.BlockSpec((H, O), lambda b, t: (0, 0)),          # W (grid-invariant)
                pl.BlockSpec((1, 1, O), lambda b, t: (b, 0, 0)),    # b_eff
            ],
            out_specs=pl.BlockSpec((1, tT, O), lambda b, t: (b, t, 0)),
            scratch_shapes=[pltpu.VMEM((H, O), mxu_dtype)],         # cached w_eff
        ),
        compiler_params=pltpu.CompilerParams(
            # b is megacore-parallel; t is "arbitrary" so the w_eff scratch
            # written at t == 0 is live for the remaining t steps of the same b.
            dimension_semantics=("parallel", "arbitrary"),
            vmem_limit_bytes=vmem_limit),
        cost_estimate=cost,
    )(x, s_row, w_lin, b_eff)


def final_layer_ref(x, c, w_ada, b_ada, w_lin, b_lin):
    """Pure-JAX reference mirroring the PyTorch forward."""
    ada = jax.nn.silu(c) @ w_ada + b_ada
    H = x.shape[-1]
    shift, scale = ada[:, :H], ada[:, H:]
    mean = jnp.mean(x, axis=-1, keepdims=True)
    var = jnp.mean((x - mean) ** 2, axis=-1, keepdims=True)
    xn = (x - mean) / jnp.sqrt(var + 1e-6)
    xm = xn * (1.0 + scale[:, None, :]) + shift[:, None, :]
    return xm @ w_lin + b_lin


if __name__ == "__main__":
    # Small, DiT-like shapes.
    B, T, H = 2, 8, 32
    patch_size, out_channels = 2, 4
    O = patch_size * patch_size * out_channels  # 16

    key = jax.random.PRNGKey(0)
    kx, kc, k1, k2, k3, k4 = jax.random.split(key, 6)

    x = jax.random.normal(kx, (B, T, H), dtype=jnp.float32)
    c = jax.random.normal(kc, (B, H), dtype=jnp.float32)

    # Deterministic parameter init (synthetic weights, not a checkpoint).
    w_ada = 0.05 * jax.random.normal(k1, (H, 2 * H), dtype=jnp.float32)
    b_ada = 0.05 * jax.random.normal(k2, (2 * H,), dtype=jnp.float32)
    w_lin = 0.05 * jax.random.normal(k3, (H, O), dtype=jnp.float32)
    b_lin = 0.05 * jax.random.normal(k4, (O,), dtype=jnp.float32)

    out = final_layer(x, c, w_ada, b_ada, w_lin, b_lin)
    out = jax.block_until_ready(out)

    ref = final_layer_ref(x, c, w_ada, b_ada, w_lin, b_lin)
    assert out.shape == (B, T, O)
    assert jnp.allclose(out, ref, atol=1e-4, rtol=1e-4), "mismatch vs reference"

    print("KERNEL_OK")
</pallas_src>

<mosaic_0001>
module attributes {stable_mosaic.version = 11 : i64} {
  func.func @_final_layer_kernel(%arg0: i32, %arg1: i32, %arg2: memref<1x8x32xf32, #tpu.memory_space<vmem>>, %arg3: memref<1x1x32xf32, #tpu.memory_space<vmem>>, %arg4: memref<32x16xf32, #tpu.memory_space<vmem>>, %arg5: memref<1x1x16xf32, #tpu.memory_space<vmem>>, %arg6: memref<1x8x16xf32, #tpu.memory_space<vmem>>, %arg7: memref<32x16xf32, #tpu.memory_space<vmem>>) attributes {dimension_semantics = [#tpu.dimension_semantics<parallel>, #tpu.dimension_semantics<arbitrary>], iteration_bounds = array<i64: 2, 1>, scalar_prefetch = 0 : i64, scratch_operands = 1 : i64, tpu.core_type = #tpu.core_type<tc>, window_params = [{transform_indices = @transform_0, window_bounds = array<i64: 1, 8, 32>}, {transform_indices = @transform_1, window_bounds = array<i64: 1, 1, 32>}, {pipeline_mode = #tpu.pipeline_mode<synchronous>, transform_indices = @transform_2, window_bounds = array<i64: 32, 16>}, {transform_indices = @transform_3, window_bounds = array<i64: 1, 1, 16>}, {transform_indices = @transform_4, window_bounds = array<i64: 1, 8, 16>}]} {
    %c0_i32 = arith.constant 0 : i32
    %0 = arith.cmpi eq, %arg1, %c0_i32 : i32
    %1 = arith.extui %0 : i1 to i32
    %c0_i32_0 = arith.constant 0 : i32
    %2 = arith.cmpi ne, %1, %c0_i32_0 : i32
    scf.if %2 {
      %c0_16 = arith.constant 0 : index
      %c0_17 = arith.constant 0 : index
      %c0_18 = arith.constant 0 : index
      %30 = vector.load %arg3[%c0_16, %c0_17, %c0_18] : memref<1x1x32xf32, #tpu.memory_space<vmem>>, vector<1x1x32xf32>
      %31 = vector.shape_cast %30 : vector<1x1x32xf32> to vector<1x32xf32>
      %32 = tpu.transpose %31, [1, 0] : vector<1x32xf32> -> vector<32x1xf32>
      %c0_19 = arith.constant 0 : index
      %c0_20 = arith.constant 0 : index
      %33 = vector.load %arg4[%c0_19, %c0_20] : memref<32x16xf32, #tpu.memory_space<vmem>>, vector<32x16xf32>
      %34 = vector.broadcast %32 : vector<32x1xf32> to vector<32x16xf32>
      %35 = arith.mulf %33, %34 : vector<32x16xf32>
      %c0_21 = arith.constant 0 : index
      %c0_22 = arith.constant 0 : index
      %36 = vector.load %arg7[%c0_21, %c0_22] : memref<32x16xf32, #tpu.memory_space<vmem>>, vector<32x16xf32>
      tpu.vector_store %arg7[%c0_21, %c0_22], %35 {strides = array<i32>} : memref<32x16xf32, #tpu.memory_space<vmem>>, vector<32x16xf32>,
    } else {
    }
    %c0 = arith.constant 0 : index
    %c0_1 = arith.constant 0 : index
    %c0_2 = arith.constant 0 : index
    %3 = vector.load %arg2[%c0, %c0_1, %c0_2] : memref<1x8x32xf32, #tpu.memory_space<vmem>>, vector<1x8x32xf32>
    %4 = vector.shape_cast %3 : vector<1x8x32xf32> to vector<8x32xf32>
    %cst = arith.constant dense<0.000000e+00> : vector<8xf32>
    %5 = vector.multi_reduction <add>, %4, %cst [1] : vector<8x32xf32> to vector<8xf32>
    %6 = vector.shape_cast %5 : vector<8xf32> to vector<8x1xf32>
    %cst_3 = arith.constant 3.200000e+01 : f32
    %7 = vector.broadcast %cst_3 : f32 to vector<8x1xf32>
    %8 = arith.divf %6, %7 : vector<8x1xf32>
    %9 = vector.broadcast %8 : vector<8x1xf32> to vector<8x32xf32>
    %10 = arith.subf %4, %9 : vector<8x32xf32>
    %11 = arith.mulf %10, %10 : vector<8x32xf32>
    %cst_4 = arith.constant dense<0.000000e+00> : vector<8xf32>
    %12 = vector.multi_reduction <add>, %11, %cst_4 [1] : vector<8x32xf32> to vector<8xf32>
    %13 = vector.shape_cast %12 : vector<8xf32> to vector<8x1xf32>
    %cst_5 = arith.constant 3.200000e+01 : f32
    %14 = vector.broadcast %cst_5 : f32 to vector<8x1xf32>
    %15 = arith.divf %13, %14 : vector<8x1xf32>
    %cst_6 = arith.constant 9.99999997E-7 : f32
    %16 = vector.broadcast %cst_6 : f32 to vector<8x1xf32>
    %17 = arith.addf %15, %16 : vector<8x1xf32>
    %18 = math.rsqrt %17 : vector<8x1xf32>
    %19 = vector.broadcast %18 : vector<8x1xf32> to vector<8x32xf32>
    %20 = arith.mulf %10, %19 : vector<8x32xf32>
    %c0_7 = arith.constant 0 : index
    %c0_8 = arith.constant 0 : index
    %21 = vector.load %arg7[%c0_7, %c0_8] : memref<32x16xf32, #tpu.memory_space<vmem>>, vector<32x16xf32>
    %cst_9 = arith.constant dense<0.000000e+00> : vector<8x16xf32>
    %22 = tpu.matmul %20, %21, %cst_9 {dimension_numbers = #tpu.dot_dimension_numbers<[1], [0], [0], [1], [0, 0, 1, 1], [], []>} : vector<8x32xf32>, vector<32x16xf32>, vector<8x16xf32> -> vector<8x16xf32>
    %c0_10 = arith.constant 0 : index
    %c0_11 = arith.constant 0 : index
    %c0_12 = arith.constant 0 : index
    %23 = vector.load %arg5[%c0_10, %c0_11, %c0_12] : memref<1x1x16xf32, #tpu.memory_space<vmem>>, vector<1x1x16xf32>
    %24 = vector.shape_cast %23 : vector<1x1x16xf32> to vector<1x16xf32>
    %25 = vector.broadcast %24 : vector<1x16xf32> to vector<8x16xf32>
    %26 = arith.addf %22, %25 : vector<8x16xf32>
    %c0_13 = arith.constant 0 : index
    %c0_14 = arith.constant 0 : index
    %c0_15 = arith.constant 0 : index
    %27 = vector.load %arg6[%c0_13, %c0_14, %c0_15] : memref<1x8x16xf32, #tpu.memory_space<vmem>>, vector<1x8x16xf32>
    %28 = vector.shape_cast %27 : vector<1x8x16xf32> to vector<8x16xf32>
    %29 = vector.shape_cast %26 : vector<8x16xf32> to vector<1x8x16xf32>
    tpu.vector_store %arg6[%c0_13, %c0_14, %c0_15], %29 {strides = array<i32>} : memref<1x8x16xf32, #tpu.memory_space<vmem>>, vector<1x8x16xf32>,
    return
  }
  func.func @transform_0(%arg0: i32, %arg1: i32) -> (i32, i32, i32) {
    %c0_i32 = arith.constant 0 : i32
    %c0_i32_0 = arith.constant 0 : i32
    return %arg0, %arg1, %c0_i32 : i32, i32, i32
  }
  func.func @transform_1(%arg0: i32, %arg1: i32) -> (i32, i32, i32) {
    %c0_i32 = arith.constant 0 : i32
    %c0_i32_0 = arith.constant 0 : i32
    %c0_i32_1 = arith.constant 0 : i32
    return %arg0, %c0_i32, %c0_i32_0 : i32, i32, i32
  }
  func.func @transform_2(%arg0: i32, %arg1: i32) -> (i32, i32) {
    %c0_i32 = arith.constant 0 : i32
    %c0_i32_0 = arith.constant 0 : i32
    %c0_i32_1 = arith.constant 0 : i32
    return %c0_i32, %c0_i32_0 : i32, i32
  }
  func.func @transform_3(%arg0: i32, %arg1: i32) -> (i32, i32, i32) {
    %c0_i32 = arith.constant 0 : i32
    %c0_i32_0 = arith.constant 0 : i32
    %c0_i32_1 = arith.constant 0 : i32
    return %arg0, %c0_i32, %c0_i32_0 : i32, i32, i32
  }
  func.func @transform_4(%arg0: i32, %arg1: i32) -> (i32, i32, i32) {
    %c0_i32 = arith.constant 0 : i32
    %c0_i32_0 = arith.constant 0 : i32
    return %arg0, %arg1, %c0_i32 : i32, i32, i32
  }
}

</mosaic_0001>

<bundles_post_ra>
// kernel: tpu_custom_call.1
= control target key start
LH: loop header
LB: loop body
LE: loop exit
PB: predicated region body
PF: predicated region fallthrough
CT: control target
= control target key end

     0   :  { %9 = vsyncpa [#allocation4], 0  ;;  %s856_s0 = inlined_call_operand.vmem [shape: f32[2,8,32], index: 0, kind: input, shape index: {}]   ;;  %s857_s1 = inlined_call_operand.vmem [shape: f32[2,1,32], index: 1, kind: input, shape index: {}]   ;;  %s858_s2 = inlined_call_operand.vmem [shape: f32[32,16], index: 2, kind: input, shape index: {}]   ;;  %s859_s3 = inlined_call_operand.vmem [shape: f32[2,1,16], index: 3, kind: input, shape index: {}]   ;;  %s860_s4 = inlined_call_operand.hbm [shape: f32[2,8,16], index: 4, kind: output, shape index: {}]  }
   0x1   :  { %11 = vsyncpa [#allocation4 + $0x1], 0  ;;  %s720_s15 = smov 0   ;;  %s722_s16 = smov 0  }
   0x2   :  { %s724_s17 = smov 0   ;;  %s726_s18 = smov 0  }
   0x3   :  { %s728_s19 = smov 0   ;;  %s730_s20 = smov 0  }
   0x4 LB: > { %s522_s21 = sadd.s32 4294967295, %s689_s20   ;;  %s523_s22 = sadd.s32 4294967294, %s689_s20   ;;  %s689_s20 = sphi %s730_s20, %s17_s20   ;;  %s685_s19 = sphi %s728_s19, %s867_s19   ;;  %s681_s18 = sphi %s726_s18, %s866_s18   ;;  %s677_s17 = sphi %s724_s17, %s865_s17   ;;  %s673_s16 = sphi %s722_s16, %s864_s16   ;;  %s669_s15 = sphi %s720_s15, %s863_s15  }
   0x5   : > { %s29_s23 = sadd.s32 1, %s685_s19  ;;  %s139_s24 = sadd.s32 1, %s677_s17 }
   0x6   : > { %p31_p0 = scmp.ge.s32.totalorder %s29_s23, 2  ;;  %p149_p1 = scmp.ne.s32.totalorder %s677_s17, %s673_s16 }
   0x7   : > { %p150_p2 = scmp.eq.s32.totalorder %s522_s21, 1  ;;  %p155_p3 = scmp.ne.s32.totalorder %s673_s16, %s669_s15 }
   0x8   : > { %s869_s23 = smov (%p31_p0, %s29_s23), 0  ;;  %p156_p5 = scmp.eq.s32.totalorder %s523_s22, 1 }
   0x9   : > { %p760_p4 = por %p150_p2, %p149_p1  ;;  %s134_s26 = ssub.s32 %s685_s19, %s869_s23 }
   0xa   : > { %p526_p6 = scmp.ge.s32.totalorder %s689_s20, 1  ;;  %p137_p7 = scmp.eq.s32.totalorder %s134_s26, 0 }
   0xb   : > { %p767_p8 = por %p156_p5, %p155_p3  ;;  %p199_p9 = scmp.lt.s32.totalorder %s689_s20, 3 }
   0xc   : > { %s773_s28 = scalar_select %p137_p7, %s677_s17, %s139_s24  }
   0xd   : > { %p200_p10 = pnand %p526_p6, %p199_p9 }
   0xe   : > { %p233_p11 = scmp.lt.s32.totalorder (!%p200_p10), %s681_s18, 1  ;;  %s532_s9 = sshll.u32 (!%p200_p10), %s681_s18, 7 }
   0xf   : > { %203 = sbr.rel (%p200_p10) target bundleno = 610 (0x262), region = 36  ;;  %s815_s14 = scalar_lea.hbm (!%p200_p10), %s860_s4, %s532_s9 }
  0x14   : > { %s777_s29 = scalar_select %p233_p11, %s681_s18, 1  ;;  %vm317_vm0 = vcmask 261120   ;;  %v691_v3 = vmov 0   ;;  %v692_v9 = vmov 0.0   ;;  %vm693_vm1 = vmmov 0   ;;  %v284_v14 = vld [vmem:[%s858_s2 + $0x8] sm:$0xff] }
  0x15   : > { %609 = vset.pattern.permute.xlu1 %v691_v3  ;;  %540 = vmatprep.subr.mxu0 %v692_v9  ;;  %vm311_vm2 = vcmask 130048   ;;  %v285_v17 = vld [vmem:[%s858_s2 + $0x10] sm:$0xff]  ;;  %v286_v20 = vld [vmem:[%s858_s2 + $0x18] sm:$0xff]  ;;  %v283_v28 = vld [vmem:[%s858_s2] sm:$0xff]  ;;  %s694_s18 = smov [#allocation3]  }
  0x16   : > { %s528_s30 = sshll.u32 %s777_s29, 3  ;;  %s242_s10 = scalar_lea.vmem %s857_s1, %s777_s29  ;;  %548 = vmatprep.mubr.msk.f32.mxu0 %vm693_vm1, %v692_v9 }
  0x17   : > { %s239_s7 = scalar_lea.vmem %s856_s0, %s528_s30  ;;  %v250_v2 = vld [vmem:[%s242_s10] sm:$0x1]  ;;  %s230_s30 = sand.u32 1, %s673_s16  }
  0x18   : > { %v316_v0 = vld [vmem:[%s239_s7] sm:$0xff]  ;;  %s527_s5 = sshll.u32 %s230_s30, 3  ;;  %s245_s8 = scalar_lea.vmem %s859_s3, %s777_s29 }
  0x19   : > { %v318_v1 = vsel %vm317_vm0, %v316_v0, 0.0  ;;  %v529_v35 = vld [vmem:[%s245_s8] ss:$0 sm:$0xff]  ;;  %s232_s10 = scalar_lea.vmem [#allocation3], %s527_s5  ;;  %s419_s21 = scalar_lea.sflag [#allocation4], %s230_s30 }
  0x1a   : > { %319 = vadd.xlane.f32.xlu0 %v318_v1  ;;  %s433_s11 = sshll.u32 %s232_s10, 4  ;;  %s617_s29 = sshll.u32 %s694_s18, 4  ;;  %s434_s11 = int_to_ptr.vmem [resolvable:$true] %s433_s11  ;;  %s618_s29 = int_to_ptr.vmem [resolvable:$false] %s617_s29 }
  0x1b   : > { %s613_s22 = scalar_lea.vmem %s434_s11, 128  ;;  %s619_s24 = scalar_lea.vmem %s618_s29, 256 }
  0x1c   : > { %p614_p12 = scmp.ne.s32.totalorder %s434_s11, %s613_s22  ;;  %p620_p1 = scmp.lt.s32.totalorder %s434_s11, %s618_s29 }
  0x1d   : > { %p621_p2 = scmp.lt.s32.totalorder %s619_s24, %s613_s22 }
  0x1e   : > { %p615_p13 = pnand %p614_p12, %p760_p4 }
  0x1f   : > { %p622_p3 = por %p621_p2, %p620_p1 }
  0x20   : > { %p616_p0 = pneg %p615_p13 }
  0x22   : > { %p623_p5 = pnand %p622_p3, %p616_p0 }
  0x47   : > { %251 = vxpose.xlu0.b32.start.end [1/1] (short) (narrow) %v250_v2, 32 }
  0x70   : > { %610 = vset.pattern.permute.xlu0 %v691_v3 }
  0xa3   : > { %v320_v4 = vpop.xlane.xlu0 %319 }
  0xa4   : > { %v322_v10 = vmul.f32 0.03125, %v320_v4 }
  0xa6   : > { %v323_v11 = vsub.f32 %v316_v0, %v322_v10 }
  0xa8   : > { %v324_v12 = vmul.f32 %v323_v11, %v323_v11 }
  0xaa   : > { %v325_v13 = vsel %vm317_vm0, %v324_v12, 0.0 }
  0xc3   : > { %v267_v5 = vpop.trf.xlu0 }
  0xc7   : > { %v268_v6 = vpop.trf.xlu0 }
  0xc8   : > { %294 = vperm.xlu1 %609, %v268_v6  }
  0xcb   : > { %v269_v7 = vpop.trf.xlu0 }
  0xcc   : > { %299 = vperm.xlu1 %609, %v269_v7  }
  0xcf   : > { %v270_v8 = vpop.trf.xlu0 }
  0xd0   : > { %304 = vperm.xlu1 %609, %v270_v8  }
  0xf4   : > { %326 = vadd.xlane.f32.xlu1 %v325_v13 }
 0x105   : > { %289 = vperm.xlu1 %609, %v267_v5  }
 0x143   : > { %v295_v15 = vpop.permute.xlu1 %294 }
 0x144   : > { %v308_v16 = vmul.f32 %v295_v15, %v284_v14 }
 0x146   : > { %313 = vst.msk [vmem:[#allocation2 + $0x8] sm:$0xff] %vm311_vm2, %v308_v16 }
 0x147   : > { %v300_v18 = vpop.permute.xlu1 %299 }
 0x148   : > { %v309_v19 = vmul.f32 %v300_v18, %v285_v17 }
 0x14a   : > { %314 = vst.msk [vmem:[#allocation2 + $0x10] sm:$0xff] %vm311_vm2, %v309_v19 }
 0x14b   : > { %v305_v21 = vpop.permute.xlu1 %304 }
 0x14c   : > { %v310_v22 = vmul.f32 %v305_v21, %v286_v20 }
 0x14d   : > { %v333_v25 = vld [vmem:[#allocation2 + $0x8] sm:$0xff] }
 0x14e   : > { %315 = vst.msk [vmem:[#allocation2 + $0x18] sm:$0xff] %vm311_vm2, %v310_v22 }
 0x151   : > { %v334_v24 = vld [vmem:[#allocation2 + $0x10] sm:$0xff] }
 0x155   : > { %v335_v23 = vld [vmem:[#allocation2 + $0x18] sm:$0xff] }
 0x156   : > { %541 = vmatpush3.msra.mxu0 %v335_v23 }
 0x157   : > { %542 = vmatprep.subr.mxu0 %v692_v9 }
 0x158   : > { %543 = vmatpush3.msra.mxu0 %v334_v24 }
 0x159   : > { %544 = vmatprep.subr.mxu0 %v692_v9 }
 0x15a   : > { %545 = vmatpush3.msra.mxu0 %v333_v25 }
 0x15b   : > { %546 = vmatprep.subr.mxu0 %v692_v9 }
 0x17d   : > { %v327_v26 = vpop.xlane.xlu1 %326 }
 0x17e   : > { %v328_v27 = vmul.f32 0.03125, %v327_v26 }
 0x180   : > { %v329_v29 = vadd.f32 1e-06, %v328_v27 }
 0x181   : > { %v290_v30 = vpop.permute.xlu1 %289 }
 0x182   : > { %611 = vrsqrt.f32 %v329_v29  ;;  %v307_v31 = vmul.f32 %v290_v30, %v283_v28 }
 0x184   : > { %312 = vst.msk [vmem:[#allocation2] sm:$0xff] %vm311_vm2, %v307_v31 }
 0x18b   : > { %v332_v32 = vld [vmem:[#allocation2] sm:$0xff] }
 0x18c   : > { %547 = vmatpush3.msra.mxu0 %v332_v32 }
 0x18f   : > { %v612_v33 = vpop.eup %611 }
 0x190   : > { %v331_v34 = vmul.f32 %v612_v33, %v323_v11 }
 0x192   : > { %549 = vmatmul.mubr.msk.f32.vlgmr.msra.gmra.mxu0 %vm317_vm0, %v331_v34 }
 0x252   : > { %v412_v36 = vpop.f32.mrf.mxu0 }
 0x253   : > { %v413_v37 = vadd.f32 %v529_v35, %v412_v36 }
 0x254   : > { %v550_v38 = vpop.f32.mrf.mxu0 }
 0x255   : > { %417 = vst.msk [vmem:[%s232_s10] sm:$0xff] %vm311_vm2, %v413_v37 }
 0x256   : > { %626 = shalt.err (!%p623_p5)
}
 0x257   : > { %s627_s26 = scalar_lea.hbm %s815_s14, 128  ;;  %s631_s6 = scalar_lea.hbm %s860_s4, 256 }
 0x258   : > { %p628_p6 = scmp.ne.s32.totalorder %s815_s14, %s627_s26  ;;  %p632_p10 = scmp.lt.s32.totalorder %s815_s14, %s860_s4 }
 0x259   : > { %p633_p11 = scmp.lt.s32.totalorder %s631_s6, %s627_s26 }
 0x25a   : > { %p629_p7 = pnand %p628_p6, %p760_p4 }
 0x25b   : > { %p634_p12 = por %p633_p11, %p632_p10 }
 0x25c   : > { %p630_p9 = pneg %p629_p7 }
 0x25e   : > { %p635_p13 = pnand %p634_p12, %p630_p9 }
 0x260   : > { %638 = shalt.err (!%p635_p13)
}
 0x261   : > { %551 = dma.vmem_to_hbm [thread:$0]  (%p760_p4), %s434_s11, 128, %s815_s14, %s419_s21  }
 0x262 PF: > { %p557_p0 = scmp.ge.s32.totalorder %s689_s20, 2  ;;  %s445_s9 = sand.u32 1, %s669_s15  }
 0x263   : > { %s446_s10 = scalar_lea.sflag [#allocation4], %s445_s9 }
 0x264   : > { %p554_p1 = pnand %p557_p0, %p767_p8 }
 0x266   : > { %p555_p2 = pneg %p554_p1 }
 0x268   : > { %664 = dma.done.wait (%p555_p2), %s446_s10, 128  }
 0x269   : > { %666 = vsyncadd (%p555_p2), %s446_s10, 4294967168  ;;  %s17_s20 = sadd.s32 1, %s689_s20   ;;  %s863_s15 = smov %s673_s16 }
 0x26a   : > { %p14_p3 = scmp.ge.s32.totalorder %s17_s20, 4   ;;  %s864_s16 = smov %s677_s17 }
 0x26b   : > { %s865_s17 = smov %s773_s28  ;;  %s866_s18 = smov %s685_s19 }
 0x26c   : > { %s867_s19 = smov %s869_s23  ;;  %16 = sbr.rel (!%p14_p3) target bundleno = 4 (0x4), region = 81 }
 0x271   :  { %451 = vsyncpa [#allocation4], 1 }
 0x272   :  { %453 = vsyncpa [#allocation4 + $0x1], 1 }

</bundles_post_ra>
